<compile_context>
chip_gen: v7x
topology: tpu7x:2x2x1
jax: 0.10.0
libtpu: 0.0.40
codegen_flags: <defaults>
</compile_context>

<pallas_src>
import jax
import jax.numpy as jnp
from jax import lax
from jax.experimental import pallas as pl
from jax.experimental.pallas import tpu as pltpu


# ---------------------------------------------------------------------------
# Kernels
# ---------------------------------------------------------------------------

def _conv_fold_kernel(planes_ref, w_ref, b_ref, o_ref):
    """3x3 / stride-2 conv on one (batch, output-pixel-tile) block.

    planes_ref: [3, tm, 3*Cin]   row-tap i holds x_pad[2r+i, 2w'+{0,1,2}, :]
                                 concatenated along channels, flattened over
                                 output pixels m = r*Wo + w'.
    w_ref:      [3, 3*Cin, Cout] tap-major folded weights.
    b_ref:      [1, Cout]        (f32)
    o_ref:      [tm, Cout]
    """
    acc = jnp.dot(planes_ref[0], w_ref[0], preferred_element_type=jnp.float32)
    acc = acc + jnp.dot(planes_ref[1], w_ref[1],
                        preferred_element_type=jnp.float32)
    acc = acc + jnp.dot(planes_ref[2], w_ref[2],
                        preferred_element_type=jnp.float32)
    o_ref[...] = (acc + b_ref[...]).astype(o_ref.dtype)


def _avg_pool_kernel(x_ref, o_ref):
    """avg_pool2d(k=2, s=2) on one (batch, row-tile) block; pure VPU.

    x_ref: [2, 2*th, Wo, C]   x_ref[q, s, w', :] = x[s, 2*w'+q, :]
    o_ref: [th, Wo, C]
    """
    th, wo, c = o_ref.shape
    xe = x_ref[0].reshape(th, 2, wo, c)     # leading-dim split only (free)
    xo = x_ref[1].reshape(th, 2, wo, c)
    pooled = (xe[:, 0] + xe[:, 1] + xo[:, 0] + xo[:, 1]) * 0.25
    o_ref[...] = pooled.astype(o_ref.dtype)


# ---------------------------------------------------------------------------
# Chip-aware tiling helpers
# ---------------------------------------------------------------------------

def _vmem_capacity_bytes():
    try:
        return int(pltpu.get_tpu_info().vmem_capacity_bytes)
    except Exception:                        # unknown chip / emulator: be safe
        return 64 * 1024 * 1024


def _chip_budgets():
    """(per-step tile budget, vmem_limit cap, min grid blocks)."""
    cap = _vmem_capacity_bytes()
    if cap >= 100 * (1 << 20):               # v5e / v6e: 128 MiB physical VMEM
        return (48 << 20), (96 << 20), 1
    # v7x: 64 MiB per TensorCore -> tighter tiles, keep >= 2 blocks for 2 TCs.
    return (20 << 20), (40 << 20), 2


def _pick_tile(total, n_batch, step_bytes, budget, min_blocks, aligns=(16, 8)):
    """Largest tile dividing `total` (aligned, or == total) under `budget`."""
    cands = set()
    for a in aligns:
        cands = {t for t in range(a, total + 1, a) if total % t == 0}
        if cands:
            break
    cands.add(total)
    cands = sorted(cands)
    fits = [t for t in cands if step_bytes(t) <= budget]
    pool = fits if fits else cands[:1]
    best = pool[-1]
    if min_blocks > 1 and n_batch * (total // best) < min_blocks:
        smaller = [t for t in pool if n_batch * (total // t) >= min_blocks]
        if smaller:
            best = smaller[-1]
    return best


def _vmem_limit(est_bytes, cap):
    if est_bytes <= 12 * (1 << 20):
        return None                          # default scoped VMEM is enough
    return min(cap, int(est_bytes * 1.25) + (8 << 20))


# ---------------------------------------------------------------------------
# Forward wrappers
# ---------------------------------------------------------------------------

def _downsample_conv(x_nchw, weight, bias, compute_dtype):
    n, c, h, w = x_nchw.shape
    cout = weight.shape[0]
    ho = (h - 2) // 2 + 1                    # after F.pad(0,1,0,1), conv3 s2
    wo = (w - 2) // 2 + 1
    m_total = ho * wo
    c3 = 3 * c
    in_dtype = x_nchw.dtype
    cdt = jnp.dtype(compute_dtype)

    # NCHW -> NHWC, zero-pad to exactly the rows/cols the conv windows read
    # (covers the PyTorch (0,1,0,1) pad; never-read extra pad is harmless).
    x_nhwc = jnp.transpose(x_nchw, (0, 2, 3, 1))
    h_need, w_need = 2 * ho + 1, 2 * wo + 1
    x_pad = jnp.pad(x_nhwc, ((0, 0), (0, h_need - h), (0, w_need - w), (0, 0)))

    # Row-tap planes with the 3 column taps folded into K:
    #   planes[n, i, r*Wo + w', j*C + ci] = x_pad[n, 2r+i, 2w'+j, ci]
    planes = jnp.stack(
        [jnp.concatenate(
            [x_pad[:, i:i + 2 * ho:2, j:j + 2 * wo:2, :] for j in range(3)],
            axis=-1).reshape(n, m_total, c3)
         for i in range(3)],
        axis=1).astype(cdt)                                 # [N, 3, M, 3C]

    # PyTorch OIHW weight -> row-tap-major [3, 3*Cin, Cout]
    w_fold = jnp.transpose(weight, (2, 3, 1, 0)).reshape(3, c3, cout).astype(cdt)
    b_row = bias.reshape(1, cout).astype(jnp.float32)

    cdt_sz = jnp.dtype(cdt).itemsize
    out_sz = jnp.dtype(in_dtype).itemsize
    w_bytes = 3 * c3 * cout * cdt_sz + 4 * cout

    def step_bytes(tm):                      # double-buffered blocks + acc + weights
        plane_blk = 3 * tm * c3 * cdt_sz
        out_blk = tm * cout * out_sz
        acc_blk = tm * cout * 4
        return 2 * plane_blk + 2 * out_blk + 2 * acc_blk + 2 * w_bytes

    budget, cap, min_blocks = _chip_budgets()
    tm = _pick_tile(m_total, n, step_bytes, budget, min_blocks, aligns=(16, 8))
    grid = (n, m_total // tm)

    out = pl.pallas_call(
        _conv_fold_kernel,
        out_shape=jax.ShapeDtypeStruct((n, m_total, cout), in_dtype),
        grid_spec=pltpu.PrefetchScalarGridSpec(
            num_scalar_prefetch=0,
            grid=grid,
            in_specs=[
                pl.BlockSpec((None, 3, tm, c3), lambda nb, mb: (nb, 0, mb, 0)),
                pl.BlockSpec((3, c3, cout), lambda nb, mb: (0, 0, 0)),
                pl.BlockSpec((1, cout), lambda nb, mb: (0, 0)),
            ],
            out_specs=pl.BlockSpec((None, tm, cout), lambda nb, mb: (nb, mb, 0)),
        ),
        compiler_params=pltpu.CompilerParams(
            dimension_semantics=("parallel", "parallel"),
            vmem_limit_bytes=_vmem_limit(step_bytes(tm), cap)),
    )(planes, w_fold, b_row)

    # TODO(synk): fuse this reshape+transpose into the kernel / keep NHWC
    # end-to-end in the surrounding model to drop an HBM pass.
    return jnp.transpose(out.reshape(n, ho, wo, cout), (0, 3, 1, 2))


def _downsample_pool(x_nchw):
    n, c, h, w = x_nchw.shape
    ho, wo = h // 2, w // 2
    in_dtype = x_nchw.dtype
    isz = jnp.dtype(in_dtype).itemsize

    x_nhwc = jnp.transpose(x_nchw, (0, 2, 3, 1))[:, :2 * ho, :2 * wo, :]
    # De-interleave even/odd columns so the kernel only adds along leading
    # axes (no lane-offset slices when C % 128 != 0): [N, 2, 2*Ho, Wo, C]
    x_cols = jnp.stack([x_nhwc[:, :, 0::2, :], x_nhwc[:, :, 1::2, :]], axis=1)

    def step_bytes(th):                      # pool-specific estimate
        in_blk = 2 * (2 * th) * wo * c * isz
        out_blk = th * wo * c * isz
        return 2 * in_blk + 2 * out_blk + in_blk   # + loaded-value temporaries

    budget, cap, min_blocks = _chip_budgets()
    th = _pick_tile(ho, n, step_bytes, budget, min_blocks, aligns=(1,))
    grid = (n, ho // th)

    out = pl.pallas_call(
        _avg_pool_kernel,
        out_shape=jax.ShapeDtypeStruct((n, ho, wo, c), in_dtype),
        grid_spec=pltpu.PrefetchScalarGridSpec(
            num_scalar_prefetch=0,
            grid=grid,
            in_specs=[pl.BlockSpec((None, 2, 2 * th, wo, c),
                                   lambda nb, rb: (nb, 0, rb, 0, 0))],
            out_specs=pl.BlockSpec((None, th, wo, c),
                                   lambda nb, rb: (nb, rb, 0, 0)),
        ),
        compiler_params=pltpu.CompilerParams(
            dimension_semantics=("parallel", "parallel"),
            vmem_limit_bytes=_vmem_limit(step_bytes(th), cap)),
    )(x_cols)
    return jnp.transpose(out, (0, 3, 1, 2))


def downsample_forward(x_nchw, weight=None, bias=None, with_conv=True,
                       compute_dtype=None):
    """Forward pass of Downsample (PyTorch semantics, NCHW in/out).

    x_nchw: [N, C, H, W]; weight: [C, C, 3, 3] OIHW; bias: [C] (iff with_conv).
    compute_dtype: MXU operand dtype; None -> bfloat16 for f32 inputs
    (accumulation is always f32).  Pass jnp.float32 for exact f32 operands.
    """
    if not with_conv:
        return _downsample_pool(x_nchw)
    if compute_dtype is None:
        compute_dtype = (jnp.bfloat16
                         if jnp.dtype(x_nchw.dtype) == jnp.dtype(jnp.float32)
                         else x_nchw.dtype)
    return _downsample_conv(x_nchw, weight, bias, compute_dtype)


# ---------------------------------------------------------------------------
# Pure-JAX reference (PyTorch semantics)
# ---------------------------------------------------------------------------

def _ref_forward(x, weight=None, bias=None, with_conv=True):
    if with_conv:
        xp = jnp.pad(x, ((0, 0), (0, 0), (0, 1), (0, 1)))
        out = lax.conv_general_dilated(
            xp, weight, window_strides=(2, 2), padding="VALID",
            dimension_numbers=("NCHW", "OIHW", "NCHW"))
        return out + bias[None, :, None, None]
    n, c, h, w = x.shape
    return x[:, :, :h // 2 * 2, :w // 2 * 2].reshape(
        n, c, h // 2, 2, w // 2, 2).mean(axis=(3, 5))


if __name__ == "__main__":
    key = jax.random.PRNGKey(0)
    kx, kw, kb, kx2, kw2, kb2 = jax.random.split(key, 6)

    # --- small shapes, exact f32-operand path ---
    N, C, H, W = 2, 4, 16, 16
    x = jax.random.normal(kx, (N, C, H, W), dtype=jnp.float32)
    weight = jax.random.normal(kw, (C, C, 3, 3), dtype=jnp.float32) * 0.1
    bias = jax.random.normal(kb, (C,), dtype=jnp.float32) * 0.1

    y_conv = downsample_forward(x, weight, bias, with_conv=True,
                                compute_dtype=jnp.float32)
    jax.block_until_ready(y_conv)
    y_conv_ref = _ref_forward(x, weight, bias, with_conv=True)
    assert y_conv.shape == (N, C, H // 2, W // 2)
    assert jnp.allclose(y_conv, y_conv_ref, atol=1e-4, rtol=1e-4)

    # --- default path: bf16 operands, f32 accumulation ---
    y_bf16 = downsample_forward(x, weight, bias, with_conv=True)
    jax.block_until_ready(y_bf16)
    assert jnp.allclose(y_bf16, y_conv_ref, atol=5e-2, rtol=5e-2)

    # --- avg_pool2d path (with_conv=False) ---
    y_pool = downsample_forward(x, with_conv=False)
    jax.block_until_ready(y_pool)
    y_pool_ref = _ref_forward(x, with_conv=False)
    assert y_pool.shape == (N, C, H // 2, W // 2)
    assert jnp.allclose(y_pool, y_pool_ref, atol=1e-4, rtol=1e-4)

    # --- wider-channel default (bf16) path ---
    C2 = 16
    x2 = jax.random.normal(kx2, (N, C2, H, W), dtype=jnp.float32)
    w2 = jax.random.normal(kw2, (C2, C2, 3, 3), dtype=jnp.float32) * 0.1
    b2 = jax.random.normal(kb2, (C2,), dtype=jnp.float32) * 0.1
    y2 = downsample_forward(x2, w2, b2, with_conv=True)
    jax.block_until_ready(y2)
    y2_ref = _ref_forward(x2, w2, b2, with_conv=True)
    assert y2.shape == (N, C2, H // 2, W // 2)
    assert jnp.allclose(y2, y2_ref, atol=0.1, rtol=0.1)

    print("KERNEL_OK")
</pallas_src>

<mosaic_0001>
module attributes {stable_mosaic.version = 11 : i64} {
  func.func @_conv_fold_kernel(%arg0: i32, %arg1: i32, %arg2: memref<1x3x64x12xf32, #tpu.memory_space<vmem>>, %arg3: memref<3x12x4xf32, #tpu.memory_space<vmem>>, %arg4: memref<1x4xf32, #tpu.memory_space<vmem>>, %arg5: memref<1x64x4xf32, #tpu.memory_space<vmem>>) attributes {dimension_semantics = [#tpu.dimension_semantics<parallel>, #tpu.dimension_semantics<parallel>], iteration_bounds = array<i64: 2, 1>, scalar_prefetch = 0 : i64, scratch_operands = 0 : i64, tpu.core_type = #tpu.core_type<tc>, window_params = [{transform_indices = @transform_0, window_bounds = array<i64: 1, 3, 64, 12>}, {pipeline_mode = #tpu.pipeline_mode<synchronous>, transform_indices = @transform_1, window_bounds = array<i64: 3, 12, 4>}, {pipeline_mode = #tpu.pipeline_mode<synchronous>, transform_indices = @transform_2, window_bounds = array<i64: 1, 4>}, {transform_indices = @transform_3, window_bounds = array<i64: 1, 64, 4>}]} {
    %c0 = arith.constant 0 : index
    %c0_0 = arith.constant 0 : index
    %c0_1 = arith.constant 0 : index
    %c0_2 = arith.constant 0 : index
    %0 = vector.load %arg2[%c0, %c0_0, %c0_1, %c0_2] : memref<1x3x64x12xf32, #tpu.memory_space<vmem>>, vector<1x1x64x12xf32>
    %1 = vector.shape_cast %0 : vector<1x1x64x12xf32> to vector<64x12xf32>
    %c0_3 = arith.constant 0 : index
    %c0_4 = arith.constant 0 : index
    %c0_5 = arith.constant 0 : index
    %2 = vector.load %arg3[%c0_3, %c0_4, %c0_5] : memref<3x12x4xf32, #tpu.memory_space<vmem>>, vector<1x12x4xf32>
    %3 = vector.shape_cast %2 : vector<1x12x4xf32> to vector<12x4xf32>
    %cst = arith.constant dense<0.000000e+00> : vector<64x4xf32>
    %4 = tpu.matmul %1, %3, %cst {dimension_numbers = #tpu.dot_dimension_numbers<[1], [0], [0], [1], [0, 0, 1, 1], [], []>} : vector<64x12xf32>, vector<12x4xf32>, vector<64x4xf32> -> vector<64x4xf32>
    %c0_6 = arith.constant 0 : index
    %c1 = arith.constant 1 : index
    %c0_7 = arith.constant 0 : index
    %c0_8 = arith.constant 0 : index
    %5 = vector.load %arg2[%c0_6, %c1, %c0_7, %c0_8] : memref<1x3x64x12xf32, #tpu.memory_space<vmem>>, vector<1x1x64x12xf32>
    %6 = vector.shape_cast %5 : vector<1x1x64x12xf32> to vector<64x12xf32>
    %c1_9 = arith.constant 1 : index
    %c0_10 = arith.constant 0 : index
    %c0_11 = arith.constant 0 : index
    %7 = vector.load %arg3[%c1_9, %c0_10, %c0_11] : memref<3x12x4xf32, #tpu.memory_space<vmem>>, vector<1x12x4xf32>
    %8 = vector.shape_cast %7 : vector<1x12x4xf32> to vector<12x4xf32>
    %cst_12 = arith.constant dense<0.000000e+00> : vector<64x4xf32>
    %9 = tpu.matmul %6, %8, %cst_12 {dimension_numbers = #tpu.dot_dimension_numbers<[1], [0], [0], [1], [0, 0, 1, 1], [], []>} : vector<64x12xf32>, vector<12x4xf32>, vector<64x4xf32> -> vector<64x4xf32>
    %10 = arith.addf %4, %9 : vector<64x4xf32>
    %c0_13 = arith.constant 0 : index
    %c2 = arith.constant 2 : index
    %c0_14 = arith.constant 0 : index
    %c0_15 = arith.constant 0 : index
    %11 = vector.load %arg2[%c0_13, %c2, %c0_14, %c0_15] : memref<1x3x64x12xf32, #tpu.memory_space<vmem>>, vector<1x1x64x12xf32>
    %12 = vector.shape_cast %11 : vector<1x1x64x12xf32> to vector<64x12xf32>
    %c2_16 = arith.constant 2 : index
    %c0_17 = arith.constant 0 : index
    %c0_18 = arith.constant 0 : index
    %13 = vector.load %arg3[%c2_16, %c0_17, %c0_18] : memref<3x12x4xf32, #tpu.memory_space<vmem>>, vector<1x12x4xf32>
    %14 = vector.shape_cast %13 : vector<1x12x4xf32> to vector<12x4xf32>
    %cst_19 = arith.constant dense<0.000000e+00> : vector<64x4xf32>
    %15 = tpu.matmul %12, %14, %cst_19 {dimension_numbers = #tpu.dot_dimension_numbers<[1], [0], [0], [1], [0, 0, 1, 1], [], []>} : vector<64x12xf32>, vector<12x4xf32>, vector<64x4xf32> -> vector<64x4xf32>
    %16 = arith.addf %10, %15 : vector<64x4xf32>
    %c0_20 = arith.constant 0 : index
    %c0_21 = arith.constant 0 : index
    %17 = vector.load %arg4[%c0_20, %c0_21] : memref<1x4xf32, #tpu.memory_space<vmem>>, vector<1x4xf32>
    %18 = vector.broadcast %17 : vector<1x4xf32> to vector<64x4xf32>
    %19 = arith.addf %16, %18 : vector<64x4xf32>
    %c0_22 = arith.constant 0 : index
    %c0_23 = arith.constant 0 : index
    %c0_24 = arith.constant 0 : index
    %20 = vector.load %arg5[%c0_22, %c0_23, %c0_24] : memref<1x64x4xf32, #tpu.memory_space<vmem>>, vector<1x64x4xf32>
    %21 = vector.shape_cast %20 : vector<1x64x4xf32> to vector<64x4xf32>
    %22 = vector.shape_cast %19 : vector<64x4xf32> to vector<1x64x4xf32>
    tpu.vector_store %arg5[%c0_22, %c0_23, %c0_24], %22 {strides = array<i32>} : memref<1x64x4xf32, #tpu.memory_space<vmem>>, vector<1x64x4xf32>,
    return
  }
  func.func @transform_0(%arg0: i32, %arg1: i32) -> (i32, i32, i32, i32) {
    %c0_i32 = arith.constant 0 : i32
    %c0_i32_0 = arith.constant 0 : i32
    %c0_i32_1 = arith.constant 0 : i32
    return %arg0, %c0_i32, %arg1, %c0_i32_0 : i32, i32, i32, i32
  }
  func.func @transform_1(%arg0: i32, %arg1: i32) -> (i32, i32, i32) {
    %c0_i32 = arith.constant 0 : i32
    %c0_i32_0 = arith.constant 0 : i32
    %c0_i32_1 = arith.constant 0 : i32
    %c0_i32_2 = arith.constant 0 : i32
    return %c0_i32, %c0_i32_0, %c0_i32_1 : i32, i32, i32
  }
  func.func @transform_2(%arg0: i32, %arg1: i32) -> (i32, i32) {
    %c0_i32 = arith.constant 0 : i32
    %c0_i32_0 = arith.constant 0 : i32
    %c0_i32_1 = arith.constant 0 : i32
    return %c0_i32, %c0_i32_0 : i32, i32
  }
  func.func @transform_3(%arg0: i32, %arg1: i32) -> (i32, i32, i32) {
    %c0_i32 = arith.constant 0 : i32
    %c0_i32_0 = arith.constant 0 : i32
    return %arg0, %arg1, %c0_i32 : i32, i32, i32
  }
}

</mosaic_0001>

<bundles_post_ra>
// kernel: tpu_custom_call.1
= control target key start
LH: loop header
LB: loop body
LE: loop exit
PB: predicated region body
PF: predicated region fallthrough
CT: control target
= control target key end

     0   :  { %s1005_s12 = smov 0   ;;  %s1007_s13 = smov 0   ;;  %s1151_s0 = inlined_call_operand.vmem [shape: f32[2,3,64,12], index: 0, kind: input, shape index: {}]   ;;  %s1152_s1 = inlined_call_operand.vmem [shape: f32[3,12,4], index: 1, kind: input, shape index: {}]   ;;  %s1153_s2 = inlined_call_operand.vmem [shape: f32[1,4], index: 2, kind: input, shape index: {}]   ;;  %s1154_s3 = inlined_call_operand.vmem [shape: f32[2,64,4], index: 3, kind: output, shape index: {}]  }
   0x1   :  { %s1009_s14 = smov 0  }
   0x2 LB: > { %s25_s15 = sadd.s32 1, %s978_s13  ;;  %p765_p0 = scmp.ge.s32.totalorder %s982_s14, 1  ;;  %s982_s14 = sphi %s1009_s14, %s13_s14   ;;  %s978_s13 = sphi %s1007_s13, %s1158_s13   ;;  %s974_s12 = sphi %s1005_s12, %s1157_s12  }
   0x3   : > { %p27_p1 = scmp.ge.s32.totalorder %s25_s15, 2  ;;  %p158_p2 = scmp.lt.s32.totalorder %s982_s14, 3 }
   0x5   : > { %s1160_s15 = smov (%p27_p1, %s25_s15), 0  ;;  %p159_p3 = pnand %p765_p0, %p158_p2 }
   0x6   : > { %v777_v0 = vld [vmem:[%s1152_s1 + $0x10] sm:$0xff] (!%p159_p3)  ;;  %v778_v1 = vld [vmem:[%s1152_s1 + $0x18] sm:$0xf] (!%p159_p3)  ;;  %vm257_vm0 = vcmask (!%p159_p3), 1043456   ;;  %v218_v2 = vld [vmem:[%s1152_s1] sm:$0xff] (!%p159_p3)  ;;  %vm984_vm1 = vmmov (!%p159_p3), 1  }
   0x7   : > { %162 = sbr.rel (%p159_p3) target bundleno = 259 (0x103), region = 32  ;;  %v898_v3 = vpack.c.bf16 (!%p159_p3), %v778_v1, %v777_v0  ;;  %vm1032_vm2 = vmpackc.low (!%p159_p3), %vm257_vm0, %vm984_vm1  ;;  %v219_v5 = vld [vmem:[%s1152_s1 + $0x8] sm:$0xf] (!%p159_p3)  ;;  %p191_p4 = scmp.lt.s32.totalorder (!%p159_p3), %s974_s12, 1  ;;  %v805_v6 = vld [vmem:[%s1152_s1 + $0x20] sm:$0xff] (!%p159_p3)  ;;  %vm232_vm3 = vcmask (!%p159_p3), 97280  }
   0x8   : > { %v904_v7 = vpack.c.bf16 (!%p159_p3), %v219_v5, %v218_v2  ;;  %v806_v8 = vld [vmem:[%s1152_s1 + $0x28] sm:$0xf] (!%p159_p3)  ;;  %v816_v39 = vld [vmem:[%s1153_s2] ss:$0 sm:$0xff] (!%p159_p3)  ;;  %vm665_vm4 = vcmask (!%p159_p3), 31744  }
   0x9   : > { %900 = vmatprep.subr.msk.bf16.mxu1 (!%p159_p3), %vm1032_vm2, %v898_v3  ;;  %v910_v9 = vpack.c.bf16 (!%p159_p3), %v806_v8, %v805_v6 }
   0xa   : > { %906 = vmatprep.subr.msk.bf16.mxu0 (!%p159_p3), %vm1032_vm2, %v904_v7  ;;  %903 = vmatpush3.bf16.msk.msra.mxu1 (!%p159_p3), %vm1032_vm2, %v898_v3 }
   0xb   : > { %909 = vmatpush3.bf16.msk.msra.mxu0 (!%p159_p3), %vm1032_vm2, %v904_v7  ;;  %916 = vmatprep.subr.msk.bf16.mxu1 (!%p159_p3), %vm1032_vm2, %v904_v7 }
   0xc   : > { %912 = vmatprep.subr.msk.bf16.mxu0 (!%p159_p3), %vm1032_vm2, %v910_v9 }
   0xe   : > { %s1162_s12 = smov (!%p191_p4, %s974_s12), 1 }
   0xf   : > { %s934_s28 = smul.u32 192, %s1162_s12  ;;  %s819_s5 = sshll.u32 %s1162_s12, 6 }
  0x10   : > { %s1124_s10 = scalar_lea.vmem %s1154_s3, %s819_s5 }
  0x11   : > { %s1063_s4 = scalar_lea.vmem %s1151_s0, %s934_s28 }
  0x12   : > { %v769_v10 = vld [vmem:[%s1063_s4 + $0x40] sm:$0xff]  ;;  %v770_v12 = vld [vmem:[%s1063_s4 + $0x48] sm:$0xff]  ;;  %v771_v14 = vld [vmem:[%s1063_s4 + $0x50] sm:$0xff] }
  0x13   : > { %v210_v11 = vld [vmem:[%s1063_s4] sm:$0xff]  ;;  %854 = vmatprep.mubr.msk.f32.mxu1 %vm232_vm3, %v769_v10  ;;  %v211_v13 = vld [vmem:[%s1063_s4 + $0x8] sm:$0xff]  ;;  %v212_v15 = vld [vmem:[%s1063_s4 + $0x10] sm:$0xff] }
  0x14   : > { %870 = vmatprep.mubr.msk.f32.mxu0 %vm232_vm3, %v210_v11  ;;  %855 = vmatmul.mubr.msk.f32.vlgmr.msra.gmra.mrb[0].mxu1 %vm232_vm3, %v770_v12  ;;  %v772_v16 = vld [vmem:[%s1063_s4 + $0x58] sm:$0xff]  ;;  %v773_v18 = vld [vmem:[%s1063_s4 + $0x60] sm:$0xff]  ;;  %v774_v20 = vld [vmem:[%s1063_s4 + $0x68] sm:$0xff] }
  0x15   : > { %871 = vmatmul.mubr.msk.f32.vlgmr.msra.gmra.mrb[0].mxu0 %vm232_vm3, %v211_v13  ;;  %917 = vmatpush3.bf16.msk.msra.mxu1 %vm1032_vm2, %v904_v7  ;;  %v213_v17 = vld [vmem:[%s1063_s4 + $0x18] sm:$0xff]  ;;  %v797_v19 = vld [vmem:[%s1063_s4 + $0x80] sm:$0xff]  ;;  %v798_v21 = vld [vmem:[%s1063_s4 + $0x88] sm:$0xff] }
  0x16   : > { %915 = vmatpush3.bf16.msk.msra.mxu0 %vm1032_vm2, %v910_v9  ;;  %857 = vmatprep.mubr.msk.f32.mxu1 %vm232_vm3, %v771_v14  ;;  %v775_v22 = vld [vmem:[%s1063_s4 + $0x70] sm:$0xff]  ;;  %v776_v24 = vld [vmem:[%s1063_s4 + $0x78] sm:$0xff]  ;;  %v214_v26 = vld [vmem:[%s1063_s4 + $0x20] sm:$0xff] }
  0x17   : > { %873 = vmatprep.mubr.msk.f32.mxu0 %vm232_vm3, %v212_v15  ;;  %v799_v23 = vld [vmem:[%s1063_s4 + $0x90] sm:$0xff]  ;;  %v800_v25 = vld [vmem:[%s1063_s4 + $0x98] sm:$0xff]  ;;  %v801_v27 = vld [vmem:[%s1063_s4 + $0xa0] sm:$0xff] }
  0x18   : > { %858 = vmatmul.mubr.msk.f32.gmra.mrb[2].mxu1 %vm232_vm3, %v772_v16  ;;  %v215_v28 = vld [vmem:[%s1063_s4 + $0x28] sm:$0xff]  ;;  %v216_v30 = vld [vmem:[%s1063_s4 + $0x30] sm:$0xff]  ;;  %v217_v32 = vld [vmem:[%s1063_s4 + $0x38] sm:$0xff] }
  0x19   : > { %874 = vmatmul.mubr.msk.f32.gmra.mrb[2].mxu0 %vm232_vm3, %v213_v17  ;;  %860 = vmatprep.mubr.msk.f32.mxu1 %vm232_vm3, %v773_v18  ;;  %v802_v29 = vld [vmem:[%s1063_s4 + $0xa8] sm:$0xff]  ;;  %v803_v31 = vld [vmem:[%s1063_s4 + $0xb0] sm:$0xff]  ;;  %v804_v33 = vld [vmem:[%s1063_s4 + $0xb8] sm:$0xff] }
  0x1a   : > { %886 = vmatprep.mubr.msk.f32.mxu0 %vm232_vm3, %v797_v19 }
  0x1c   : > { %861 = vmatmul.mubr.msk.f32.gmra.mrb[4].mxu1 %vm232_vm3, %v774_v20 }
  0x1d   : > { %887 = vmatmul.mubr.msk.f32.vlgmr.msra.gmra.mrb[0].mxu0 %vm232_vm3, %v798_v21  ;;  %863 = vmatprep.mubr.msk.f32.mxu1 %vm232_vm3, %v775_v22 }
  0x1e   : > { %889 = vmatprep.mubr.msk.f32.mxu0 %vm232_vm3, %v799_v23 }
  0x20   : > { %864 = vmatmul.mubr.msk.f32.gmra.mrb[6].mxu1 %vm232_vm3, %v776_v24 }
  0x21   : > { %890 = vmatmul.mubr.msk.f32.gmra.mrb[2].mxu0 %vm232_vm3, %v800_v25  ;;  %876 = vmatprep.mubr.msk.f32.mxu1 %vm232_vm3, %v214_v26 }
  0x22   : > { %892 = vmatprep.mubr.msk.f32.mxu0 %vm232_vm3, %v801_v27 }
  0x24   : > { %877 = vmatmul.mubr.msk.f32.vlgmr.msra.gmra.mrb[4].mxu1 %vm232_vm3, %v215_v28 }
  0x25   : > { %893 = vmatmul.mubr.msk.f32.gmra.mrb[4].mxu0 %vm232_vm3, %v802_v29  ;;  %879 = vmatprep.mubr.msk.f32.mxu1 %vm232_vm3, %v216_v30 }
  0x26   : > { %895 = vmatprep.mubr.msk.f32.mxu0 %vm232_vm3, %v803_v31 }
  0x28   : > { %880 = vmatmul.mubr.msk.f32.gmra.mrb[6].mxu1 %vm232_vm3, %v217_v32 }
  0x29   : > { %896 = vmatmul.mubr.msk.f32.gmra.mrb[6].mxu0 %vm232_vm3, %v804_v33 }
  0xe7   : > { %v856_v34 = vpop.f32.mrb[0].mxu1 }
  0xe8   : > { %v327_v35 = vpop.f32.mrb[1].mxu1 }
  0xeb   : > { %v859_v36 = vpop.f32.mrb[2].mxu1 }
  0xec   : > { %v337_v37 = vpop.f32.mrb[3].mxu1 }
  0xf0   : > { %v888_v38 = vpop.f32.mrb[0].mxu0 }
  0xf1   : > { %v918_v40 = vadd.f32 %v888_v38, %v856_v34  ;;  %v603_v41 = vpop.f32.mrb[1].mxu0 }
  0xf2   : > { %v919_v42 = vadd.f32 %v603_v41, %v327_v35 }
  0xf3   : > { %v658_v43 = vadd.f32 %v918_v40, %v816_v39 }
  0xf4   : > { %v657_v44 = vadd.f32 %v919_v42, %v816_v39  ;;  %v891_v45 = vpop.f32.mrb[2].mxu0 }
  0xf5   : > { %667 = vst.msk [vmem:[%s1124_s10 + $0x8] sm:$0xff] %vm665_vm4, %v658_v43  ;;  %v920_v46 = vadd.f32 %v891_v45, %v859_v36  ;;  %v613_v47 = vpop.f32.mrb[3].mxu0 }
  0xf6   : > { %666 = vst.msk [vmem:[%s1124_s10] sm:$0xff] %vm665_vm4, %v657_v44  ;;  %v921_v48 = vadd.f32 %v613_v47, %v337_v37 }
  0xf7   : > { %v660_v49 = vadd.f32 %v920_v46, %v816_v39  ;;  %v878_v51 = vpop.f32.mrb[4].mxu1 }
  0xf8   : > { %v659_v50 = vadd.f32 %v921_v48, %v816_v39  ;;  %v894_v52 = vpop.f32.mrb[4].mxu0  ;;  %v479_v54 = vpop.f32.mrb[5].mxu1 }
  0xf9   : > { %669 = vst.msk [vmem:[%s1124_s10 + $0x18] sm:$0xff] %vm665_vm4, %v660_v49  ;;  %v922_v53 = vadd.f32 %v894_v52, %v878_v51  ;;  %v623_v55 = vpop.f32.mrb[5].mxu0 }
  0xfa   : > { %668 = vst.msk [vmem:[%s1124_s10 + $0x10] sm:$0xff] %vm665_vm4, %v659_v50  ;;  %v923_v56 = vadd.f32 %v623_v55, %v479_v54 }
  0xfb   : > { %v662_v57 = vadd.f32 %v922_v53, %v816_v39  ;;  %v881_v59 = vpop.f32.mrb[6].mxu1 }
  0xfc   : > { %v661_v58 = vadd.f32 %v923_v56, %v816_v39  ;;  %v897_v60 = vpop.f32.mrb[6].mxu0  ;;  %v489_v62 = vpop.f32.mrb[7].mxu1 }
  0xfd   : > { %671 = vst.msk [vmem:[%s1124_s10 + $0x28] sm:$0xff] %vm665_vm4, %v662_v57  ;;  %v924_v61 = vadd.f32 %v897_v60, %v881_v59  ;;  %v633_v63 = vpop.f32.mrb[7].mxu0 }
  0xfe   : > { %670 = vst.msk [vmem:[%s1124_s10 + $0x20] sm:$0xff] %vm665_vm4, %v661_v58  ;;  %v925_v0 = vadd.f32 %v633_v63, %v489_v62 }
  0xff   : > { %v664_v1 = vadd.f32 %v924_v61, %v816_v39 }
 0x100   : > { %v663_v2 = vadd.f32 %v925_v0, %v816_v39 }
 0x101   : > { %673 = vst.msk [vmem:[%s1124_s10 + $0x38] sm:$0xff] %vm665_vm4, %v664_v1 }
 0x102   : > { %672 = vst.msk [vmem:[%s1124_s10 + $0x30] sm:$0xff] %vm665_vm4, %v663_v2 }
 0x103 PF: > { %s13_s14 = sadd.s32 1, %s982_s14   ;;  %s1157_s12 = smov %s978_s13 }
 0x104   : > { %p10_p5 = scmp.ge.s32.totalorder %s13_s14, 4   ;;  %s1158_s13 = smov %s1160_s15 }
 0x106   :  { %12 = sbr.rel (!%p10_p5) target bundleno = 2 (0x2), region = 66 }

</bundles_post_ra>
